<compile_context>
chip_gen: v5e
topology: v5e:2x2
jax: 0.10.0
libtpu: 0.0.40
codegen_flags: <defaults>
</compile_context>

<pallas_src>
import math

import jax
import jax.numpy as jnp
from jax.experimental import pallas as pl
from jax.experimental.pallas import tpu as pltpu


_LANE = 128      # TPU lane width (last-dim tiling unit)
_SUBLANE = 8     # f32 sublane count (second-to-last-dim tiling unit)


def _round_up(x, m):
    return ((x + m - 1) // m) * m


def _make_ffn_kernel(num_layers):
    """Kernel computing the full MLP for one batch tile.

    Ref order: x_ref, w0, b0, w1, b1, ..., w_{L-1}, b_{L-1}, o_ref.
    ReLU after every layer except the last (Identity output activation).
    """

    def kernel(*refs):
        x_ref = refs[0]
        o_ref = refs[-1]
        param_refs = refs[1:-1]

        h = x_ref[...]
        for k in range(num_layers):
            w = param_refs[2 * k][...]
            b = param_refs[2 * k + 1][...]            # (1, out_k)
            # Feed the MXU in the weights' dtype (bf16 weights -> bf16 MXU on
            # v6e/v7x); always accumulate in f32.
            h = jnp.dot(h.astype(w.dtype), w,
                        preferred_element_type=jnp.float32)
            h = h + b.astype(jnp.float32)
            if k < num_layers - 1:
                h = jnp.maximum(h, 0.0)               # nn.ReLU
            # last layer: nn.Identity -> nothing
        o_ref[...] = h.astype(o_ref.dtype)

    return kernel


def ffn_forward(x, weights, biases, *, max_tile_m=512):
    """Runs the fused FFN kernel.

    x:        [B, sizes[0]]
    weights:  list of (in_k, out_k) arrays (PyTorch W.T); f32 or bf16
    biases:   list of (out_k,) arrays
    returns:  [B, sizes[-1]] in x.dtype
    """
    num_layers = len(weights)
    B, d_in = x.shape
    d_out = weights[-1].shape[1]
    out_dtype = x.dtype

    # ---- lane-dense output: pad the final layer's out-dim to a multiple of 128 ----
    d_out_p = _round_up(d_out, _LANE)
    w_last, b_last = weights[-1], biases[-1]
    if d_out_p != d_out:
        w_last = jnp.pad(w_last, ((0, 0), (0, d_out_p - d_out)))
        b_last = jnp.pad(b_last, ((0, d_out_p - d_out),))
    weights = list(weights[:-1]) + [w_last]
    biases = list(biases[:-1]) + [b_last]

    # ---- batch tiling: few fat, MXU-aligned grid steps ----
    if B <= max_tile_m:
        tile_m, padded_B = B, B                 # single grid step for small problems
    else:
        tile_m = max_tile_m                     # multiple of 8 (and of 128)
        padded_B = _round_up(B, tile_m)
    x_p = x if padded_B == B else jnp.pad(x, ((0, padded_B - B), (0, 0)))

    biases2d = [b.reshape(1, -1) for b in biases]
    kernel = _make_ffn_kernel(num_layers)

    in_specs = [pl.BlockSpec((tile_m, d_in), lambda i: (i, 0))]
    params = []
    for w, b in zip(weights, biases2d):
        in_specs.append(pl.BlockSpec(w.shape, lambda i: (0, 0)))   # weight: resident
        in_specs.append(pl.BlockSpec(b.shape, lambda i: (0, 0)))   # bias:   resident
        params.extend([w, b])
    out_specs = pl.BlockSpec((tile_m, d_out_p), lambda i: (i, 0))

    # VMEM budget: double-buffered x/out tiles + (double-buffered) resident params
    # + activation headroom. Capped at v7x's 64 MiB physical VMEM.
    est = 2 * tile_m * d_in * x_p.dtype.itemsize
    est += 2 * tile_m * d_out_p * jnp.dtype(out_dtype).itemsize
    est += 2 * sum(math.prod(p.shape) * p.dtype.itemsize for p in params)
    widest = max(w.shape[1] for w in weights)
    est += 4 * tile_m * widest * 4
    vmem_limit = int(min(64 << 20, max(est, 16 << 20)))

    out_p = pl.pallas_call(
        kernel,
        out_shape=jax.ShapeDtypeStruct((padded_B, d_out_p), out_dtype),
        grid_spec=pltpu.PrefetchScalarGridSpec(
            num_scalar_prefetch=0,
            grid=(padded_B // tile_m,),
            in_specs=in_specs,
            out_specs=out_specs,
        ),
        compiler_params=pltpu.CompilerParams(
            dimension_semantics=("parallel",),
            vmem_limit_bytes=vmem_limit,
        ),
    )(x_p, *params)

    # Strip batch / lane padding (no-op slices when nothing was padded).
    return out_p[:B, :d_out]


def init_ffn_params(sizes, key):
    """Deterministic synthetic params. Shapes follow nn.Linear(sizes[j], sizes[j+1]),
    but weights are stored as (in, out) = PyTorch W.T."""
    weights, biases = [], []
    for j in range(len(sizes) - 1):
        key, kw, kb = jax.random.split(key, 3)
        fan_in = sizes[j]
        bound = 1.0 / jnp.sqrt(fan_in)
        w = jax.random.uniform(kw, (sizes[j], sizes[j + 1]), jnp.float32,
                               minval=-bound, maxval=bound)
        b = jax.random.uniform(kb, (sizes[j + 1],), jnp.float32,
                               minval=-bound, maxval=bound)
        weights.append(w)
        biases.append(b)
    return weights, biases


def ffn_reference(x, weights, biases):
    h = x
    for k, (w, b) in enumerate(zip(weights, biases)):
        h = h @ w + b
        if k < len(weights) - 1:
            h = jnp.maximum(h, 0.0)
    return h


if __name__ == "__main__":
    key = jax.random.PRNGKey(0)
    sizes = [4, 32, 32, 2]          # FFN(sizes=[4, 32, 32, 2]) with defaults
    batch = 16

    key, kx = jax.random.split(key)
    x = jax.random.normal(kx, (batch, sizes[0]), jnp.float32)
    weights, biases = init_ffn_params(sizes, key)

    # TODO(synk): batch_norm=True constructor path (nn.BatchNorm1d layers) not implemented.
    out = ffn_forward(x, weights, biases)
    out = jax.block_until_ready(out)

    ref = ffn_reference(x, weights, biases)
    assert out.shape == (batch, sizes[-1])
    assert jnp.allclose(out, ref, atol=1e-5, rtol=1e-5), "mismatch vs reference"

    print("KERNEL_OK")
</pallas_src>

<mosaic_0001>
module attributes {stable_mosaic.version = 11 : i64} {
  func.func @kernel(%arg0: i32, %arg1: memref<16x4xf32, #tpu.memory_space<vmem>>, %arg2: memref<4x32xf32, #tpu.memory_space<vmem>>, %arg3: memref<1x32xf32, #tpu.memory_space<vmem>>, %arg4: memref<32x32xf32, #tpu.memory_space<vmem>>, %arg5: memref<1x32xf32, #tpu.memory_space<vmem>>, %arg6: memref<32x128xf32, #tpu.memory_space<vmem>>, %arg7: memref<1x128xf32, #tpu.memory_space<vmem>>, %arg8: memref<16x128xf32, #tpu.memory_space<vmem>>) attributes {dimension_semantics = [#tpu.dimension_semantics<parallel>], iteration_bounds = array<i64: 1>, scalar_prefetch = 0 : i64, scratch_operands = 0 : i64, tpu.core_type = #tpu.core_type<tc>, window_params = [{transform_indices = @transform_0, window_bounds = array<i64: 16, 4>}, {pipeline_mode = #tpu.pipeline_mode<synchronous>, transform_indices = @transform_1, window_bounds = array<i64: 4, 32>}, {pipeline_mode = #tpu.pipeline_mode<synchronous>, transform_indices = @transform_2, window_bounds = array<i64: 1, 32>}, {pipeline_mode = #tpu.pipeline_mode<synchronous>, transform_indices = @transform_3, window_bounds = array<i64: 32, 32>}, {pipeline_mode = #tpu.pipeline_mode<synchronous>, transform_indices = @transform_4, window_bounds = array<i64: 1, 32>}, {pipeline_mode = #tpu.pipeline_mode<synchronous>, transform_indices = @transform_5, window_bounds = array<i64: 32, 128>}, {pipeline_mode = #tpu.pipeline_mode<synchronous>, transform_indices = @transform_6, window_bounds = array<i64: 1, 128>}, {transform_indices = @transform_7, window_bounds = array<i64: 16, 128>}]} {
    %c0 = arith.constant 0 : index
    %c0_0 = arith.constant 0 : index
    %0 = vector.load %arg1[%c0, %c0_0] : memref<16x4xf32, #tpu.memory_space<vmem>>, vector<16x4xf32>
    %c0_1 = arith.constant 0 : index
    %c0_2 = arith.constant 0 : index
    %1 = vector.load %arg2[%c0_1, %c0_2] : memref<4x32xf32, #tpu.memory_space<vmem>>, vector<4x32xf32>
    %c0_3 = arith.constant 0 : index
    %c0_4 = arith.constant 0 : index
    %2 = vector.load %arg3[%c0_3, %c0_4] : memref<1x32xf32, #tpu.memory_space<vmem>>, vector<1x32xf32>
    %cst = arith.constant dense<0.000000e+00> : vector<16x32xf32>
    %3 = tpu.matmul %0, %1, %cst {dimension_numbers = #tpu.dot_dimension_numbers<[1], [0], [0], [1], [0, 0, 1, 1], [], []>} : vector<16x4xf32>, vector<4x32xf32>, vector<16x32xf32> -> vector<16x32xf32>
    %4 = vector.broadcast %2 : vector<1x32xf32> to vector<16x32xf32>
    %5 = arith.addf %3, %4 : vector<16x32xf32>
    %cst_5 = arith.constant 0.000000e+00 : f32
    %6 = vector.broadcast %cst_5 : f32 to vector<16x32xf32>
    %7 = arith.maximumf %5, %6 : vector<16x32xf32>
    %c0_6 = arith.constant 0 : index
    %c0_7 = arith.constant 0 : index
    %8 = vector.load %arg4[%c0_6, %c0_7] : memref<32x32xf32, #tpu.memory_space<vmem>>, vector<32x32xf32>
    %c0_8 = arith.constant 0 : index
    %c0_9 = arith.constant 0 : index
    %9 = vector.load %arg5[%c0_8, %c0_9] : memref<1x32xf32, #tpu.memory_space<vmem>>, vector<1x32xf32>
    %cst_10 = arith.constant dense<0.000000e+00> : vector<16x32xf32>
    %10 = tpu.matmul %7, %8, %cst_10 {dimension_numbers = #tpu.dot_dimension_numbers<[1], [0], [0], [1], [0, 0, 1, 1], [], []>} : vector<16x32xf32>, vector<32x32xf32>, vector<16x32xf32> -> vector<16x32xf32>
    %11 = vector.broadcast %9 : vector<1x32xf32> to vector<16x32xf32>
    %12 = arith.addf %10, %11 : vector<16x32xf32>
    %cst_11 = arith.constant 0.000000e+00 : f32
    %13 = vector.broadcast %cst_11 : f32 to vector<16x32xf32>
    %14 = arith.maximumf %12, %13 : vector<16x32xf32>
    %c0_12 = arith.constant 0 : index
    %c0_13 = arith.constant 0 : index
    %15 = vector.load %arg6[%c0_12, %c0_13] : memref<32x128xf32, #tpu.memory_space<vmem>>, vector<32x128xf32>
    %c0_14 = arith.constant 0 : index
    %c0_15 = arith.constant 0 : index
    %16 = vector.load %arg7[%c0_14, %c0_15] : memref<1x128xf32, #tpu.memory_space<vmem>>, vector<1x128xf32>
    %cst_16 = arith.constant dense<0.000000e+00> : vector<16x128xf32>
    %17 = tpu.matmul %14, %15, %cst_16 {dimension_numbers = #tpu.dot_dimension_numbers<[1], [0], [0], [1], [0, 0, 1, 1], [], []>} : vector<16x32xf32>, vector<32x128xf32>, vector<16x128xf32> -> vector<16x128xf32>
    %18 = vector.broadcast %16 : vector<1x128xf32> to vector<16x128xf32>
    %19 = arith.addf %17, %18 : vector<16x128xf32>
    %c0_17 = arith.constant 0 : index
    %c0_18 = arith.constant 0 : index
    %20 = vector.load %arg8[%c0_17, %c0_18] : memref<16x128xf32, #tpu.memory_space<vmem>>, vector<16x128xf32>
    tpu.vector_store %arg8[%c0_17, %c0_18], %19 {strides = array<i32>} : memref<16x128xf32, #tpu.memory_space<vmem>>, vector<16x128xf32>,
    return
  }
  func.func @transform_0(%arg0: i32) -> (i32, i32) {
    %c0_i32 = arith.constant 0 : i32
    %c0_i32_0 = arith.constant 0 : i32
    return %arg0, %c0_i32 : i32, i32
  }
  func.func @transform_1(%arg0: i32) -> (i32, i32) {
    %c0_i32 = arith.constant 0 : i32
    %c0_i32_0 = arith.constant 0 : i32
    %c0_i32_1 = arith.constant 0 : i32
    return %c0_i32, %c0_i32_0 : i32, i32
  }
  func.func @transform_2(%arg0: i32) -> (i32, i32) {
    %c0_i32 = arith.constant 0 : i32
    %c0_i32_0 = arith.constant 0 : i32
    %c0_i32_1 = arith.constant 0 : i32
    return %c0_i32, %c0_i32_0 : i32, i32
  }
  func.func @transform_3(%arg0: i32) -> (i32, i32) {
    %c0_i32 = arith.constant 0 : i32
    %c0_i32_0 = arith.constant 0 : i32
    %c0_i32_1 = arith.constant 0 : i32
    return %c0_i32, %c0_i32_0 : i32, i32
  }
  func.func @transform_4(%arg0: i32) -> (i32, i32) {
    %c0_i32 = arith.constant 0 : i32
    %c0_i32_0 = arith.constant 0 : i32
    %c0_i32_1 = arith.constant 0 : i32
    return %c0_i32, %c0_i32_0 : i32, i32
  }
  func.func @transform_5(%arg0: i32) -> (i32, i32) {
    %c0_i32 = arith.constant 0 : i32
    %c0_i32_0 = arith.constant 0 : i32
    %c0_i32_1 = arith.constant 0 : i32
    return %c0_i32, %c0_i32_0 : i32, i32
  }
  func.func @transform_6(%arg0: i32) -> (i32, i32) {
    %c0_i32 = arith.constant 0 : i32
    %c0_i32_0 = arith.constant 0 : i32
    %c0_i32_1 = arith.constant 0 : i32
    return %c0_i32, %c0_i32_0 : i32, i32
  }
  func.func @transform_7(%arg0: i32) -> (i32, i32) {
    %c0_i32 = arith.constant 0 : i32
    %c0_i32_0 = arith.constant 0 : i32
    return %arg0, %c0_i32 : i32, i32
  }
}

</mosaic_0001>

<bundles_post_ra>
// kernel: tpu_custom_call.1
= control target key start
LH: loop header
LB: loop body
LE: loop exit
PB: predicated region body
PF: predicated region fallthrough
CT: control target
= control target key end

     0   :  { %12 = vsyncpa [#allocation3], 0  ;;  %s383_s0 = inlined_call_operand.vmem [shape: f32[16,4], index: 0, kind: input, shape index: {}]   ;;  %s384_s1 = inlined_call_operand.vmem [shape: f32[4,32], index: 1, kind: input, shape index: {}]   ;;  %s385_s2 = inlined_call_operand.vmem [shape: f32[1,32], index: 2, kind: input, shape index: {}]   ;;  %s386_s3 = inlined_call_operand.hbm [shape: f32[32,32], index: 3, kind: input, shape index: {}]   ;;  %s387_s4 = inlined_call_operand.vmem [shape: f32[1,32], index: 4, kind: input, shape index: {}]   ;;  %s388_s5 = inlined_call_operand.hbm [shape: f32[32,128], index: 5, kind: input, shape index: {}]   ;;  %s389_s6 = inlined_call_operand.vmem [shape: f32[1,128], index: 6, kind: input, shape index: {}]   ;;  %s390_s7 = inlined_call_operand.hbm [shape: f32[16,128], index: 7, kind: output, shape index: {}]  }
   0x1   :  { %13 = vsyncpa [#allocation6], 0 }
   0x2   :  { %14 = vsyncpa [#allocation4], 0  ;;  %s25_s26 = sshll.u32 %s386_s3, 4  ;;  %s298_s27 = smov [#allocation2]   ;;  %s26_s26 = int_to_ptr.hbm [resolvable:$true] %s25_s26 }
   0x3   :  { %s27_s28 = sshll.u32 %s298_s27, 4  ;;  %s40_s8 = sshll.u32 %s388_s5, 4  ;;  %s28_s28 = int_to_ptr.vmem [resolvable:$true] %s27_s28  ;;  %s41_s8 = int_to_ptr.hbm [resolvable:$true] %s40_s8 }
   0x4   :  { %s299_s9 = smov 128   ;;  %s300_s10 = smov 8  }
   0x5   :  { %33 = dma.hbm_to_vmem [thread:$0]  %s26_s26, 512, %s28_s28, [#allocation3], %s299_s9, %s299_s9, %s300_s10  }
   0x6   :  { %s301_s11 = smov [#allocation5]  }
   0x7   :  { %s42_s12 = sshll.u32 %s301_s11, 4  ;;  %s43_s12 = int_to_ptr.vmem [resolvable:$true] %s42_s12 }
   0x8   :  { %48 = dma.hbm_to_vmem [thread:$0]  %s41_s8, 512, %s43_s12, [#allocation6], %s299_s9, %s299_s9, %s300_s10  }
   0x9   :  { %292 = dma.done.wait [#allocation3], 512  }
   0xa   :  { %293 = vsyncadd [#allocation3], 4294966784 }
   0xb   :  { %294 = dma.done.wait [#allocation6], 512  }
   0xc   :  { %295 = vsyncadd [#allocation6], 4294966784  ;;  %vm73_vm0 = vcmask 1043456   ;;  %vm66_vm1 = vcmask 31744   ;;  %v61_v0 = vld [vmem:[%s384_s1] sm:$0xf] }
   0xd   :  { %v59_v1 = vld [vmem:[%s383_s0] sm:$0xff]  ;;  %201 = vmatpush.msk.msra.mxu0 %vm73_vm0, %v61_v0  ;;  %v105_v2 = vld [vmem:[#allocation2 + $0x18] sm:$0xff]  ;;  %v60_v3 = vld [vmem:[%s383_s0 + $0x8] sm:$0xff]  ;;  %vm110_vm2 = vcmask 261120   ;;  %s302_s20 = smov [#allocation7]   ;;  %s187_s23 = sshll.u32 %s390_s7, 4  ;;  %s188_s23 = int_to_ptr.hbm [resolvable:$true] %s187_s23 }
   0xe   :  { %202 = vmatmul.msk.f32.vlgmr.msra.gmra.mxu0 %vm66_vm1, %v59_v1  ;;  %129 = vmatpush.msra.mxu1 %v105_v2  ;;  %v104_v4 = vld [vmem:[#allocation2 + $0x10] sm:$0xff]  ;;  %v103_v5 = vld [vmem:[#allocation2 + $0x8] sm:$0xff]  ;;  %v102_v6 = vld [vmem:[#allocation2] sm:$0xff]  ;;  %s185_s21 = sshll.u32 %s302_s20, 4  ;;  %s186_s21 = int_to_ptr.vmem [resolvable:$true] %s185_s21 }
   0xf   :  { %208 = vmatpush.msra.mxu3 %v105_v2  ;;  %v145_v7 = vld [vmem:[#allocation5 + $0x18] sm:$0xff]  ;;  %v217_v8 = vld [vmem:[%s385_s2] ss:$0 sm:$0xff]  ;;  %v144_v15 = vld [vmem:[#allocation5 + $0x10] sm:$0xff] }
  0x10   :  { %130 = vmatpush.msra.mxu1 %v104_v4  ;;  %168 = vmatpush.msra.mxu2 %v145_v7  ;;  %v143_v16 = vld [vmem:[#allocation5 + $0x8] sm:$0xff]  ;;  %v142_v17 = vld [vmem:[#allocation5] sm:$0xff] }
  0x11   :  { %209 = vmatpush.msra.mxu3 %v104_v4  ;;  %v218_v18 = vld [vmem:[%s387_s4] ss:$0 sm:$0xff] }
  0x12   :  { %131 = vmatpush.msra.mxu1 %v103_v5  ;;  %169 = vmatpush.msra.mxu2 %v144_v15  ;;  %v219_v25 = vld [vmem:[%s389_s6] ss:$0 sm:$0xff] }
  0x13   :  { %210 = vmatpush.msra.mxu3 %v103_v5 }
  0x14   :  { %132 = vmatpush.msra.mxu1 %v102_v6  ;;  %170 = vmatpush.msra.mxu2 %v143_v16 }
  0x15   :  { %211 = vmatpush.msra.mxu3 %v102_v6 }
  0x16   :  { %203 = vmatmul.msk.f32.gmra.mxu0 %vm66_vm1, %v60_v3  ;;  %171 = vmatpush.msra.mxu2 %v142_v17 }
  0x8b   :  { %v94_v9 = vpop.f32.mrf.mxu0 }
  0x8c   :  { %v95_v10 = vadd.f32 %v217_v8, %v94_v9 }
  0x8e   :  { %v100_v11 = vmax.f32 %v95_v10, 0.0 }
  0x90   :  { %204 = vmatmul.msk.f32.vlgmr.msra.gmra.mxu1 %vm110_vm2, %v100_v11 }
  0x93   :  { %v97_v12 = vpop.f32.mrf.mxu0 }
  0x94   :  { %v98_v13 = vadd.f32 %v217_v8, %v97_v12 }
  0x96   :  { %v101_v14 = vmax.f32 %v98_v13, 0.0 }
  0x98   :  { %205 = vmatmul.msk.f32.vlgmr.msra.gmra.mxu3 %vm110_vm2, %v101_v14 }
 0x10d   :  { %v134_v19 = vpop.f32.mrf.mxu1 }
 0x10e   :  { %v135_v20 = vadd.f32 %v218_v18, %v134_v19 }
 0x110   :  { %v140_v21 = vmax.f32 %v135_v20, 0.0 }
 0x112   :  { %206 = vmatmul.msk.f32.vlgmr.msra.gmra.mxu2 %vm110_vm2, %v140_v21 }
 0x11b   :  { %v137_v22 = vpop.f32.mrf.mxu3 }
 0x11c   :  { %v138_v23 = vadd.f32 %v218_v18, %v137_v22 }
 0x11e   :  { %v141_v24 = vmax.f32 %v138_v23, 0.0 }
 0x120   :  { %207 = vmatmul.msk.f32.gmra.mxu2 %vm110_vm2, %v141_v24 }
 0x195   :  { %v173_v26 = vpop.f32.mrf.mxu2 }
 0x196   :  { %v174_v27 = vadd.f32 %v219_v25, %v173_v26 }
 0x198   :  { %179 = vst [vmem:[#allocation7] sm:$0xff] %v174_v27 }
 0x1a3   :  { %v176_v28 = vpop.f32.mrf.mxu2 }
 0x1a4   :  { %v177_v29 = vadd.f32 %v219_v25, %v176_v28 }
 0x1a6   :  { %180 = vst [vmem:[#allocation7 + $0x8] sm:$0xff] %v177_v29 }
 0x1a7   :  { %193 = dma.vmem_to_hbm [thread:$0]  %s186_s21, 256, %s188_s23, [#allocation4], %s299_s9, %s299_s9, %s300_s10  }
 0x1a8   :  { %296 = dma.done.wait [#allocation4], 256  }
 0x1a9   :  { %297 = vsyncadd [#allocation4], 4294967040 }
 0x1aa   :  { %198 = vsyncpa [#allocation3], 1 }
 0x1ab   :  { %199 = vsyncpa [#allocation6], 1 }
 0x1ac   :  { %200 = vsyncpa [#allocation4], 1 }

</bundles_post_ra>
